<compile_context>
chip_gen: v5e
topology: v5e:2x2
jax: 0.10.0
libtpu: 0.0.40
codegen_flags: <defaults>
</compile_context>

<pallas_src>
import functools

import jax
import jax.numpy as jnp
from jax.experimental import pallas as pl
from jax.experimental.pallas import tpu as pltpu


def _round_up(n, m):
    return ((n + m - 1) // m) * m


def _vae_kernel(x_ref, eps_ref,
                w_enc_ref, b_enc_ref,
                w_musig_ref, b_musig_ref,
                w_d1_ref, b_d1_ref,
                w_d2_ref, b_d2_ref,
                recon_ref, musig_ref,
                *, latent_size):
    x = x_ref[...]

    # ---- Encoder: relu(x @ W_enc + b_enc) ----
    h = jnp.dot(x, w_enc_ref[...], preferred_element_type=jnp.float32) + b_enc_ref[...]
    h = jnp.maximum(h, 0.0)

    # ---- Fused mu|sigma projection (one MXU pass over the lane-padded slab) ----
    musig = jnp.dot(h, w_musig_ref[...], preferred_element_type=jnp.float32) + b_musig_ref[...]
    mu = musig[:, :latent_size]
    sigma = musig[:, latent_size:2 * latent_size]

    # ---- Reparameterization: z = mu + eps * sigma ----
    z = mu + eps_ref[...] * sigma

    # ---- Decoder: sigmoid(relu(z @ W_d1 + b_d1) @ W_d2 + b_d2) ----
    hd = jnp.dot(z, w_d1_ref[...], preferred_element_type=jnp.float32) + b_d1_ref[...]
    hd = jnp.maximum(hd, 0.0)
    logits = jnp.dot(hd, w_d2_ref[...], preferred_element_type=jnp.float32) + b_d2_ref[...]
    recon = jax.nn.sigmoid(logits)

    # Lane-dense (128-multiple last dim) unmasked stores.
    recon_ref[...] = recon.astype(recon_ref.dtype)
    musig_ref[...] = musig.astype(musig_ref.dtype)


def _pick_tile_b(requested, B, row_bytes, weight_bytes, budget_bytes=24 << 20):
    """Largest power-of-two-ish tile <= requested whose double-buffered tiles fit VMEM."""
    tile = max(8, min(requested, _round_up(B, 8)))
    while tile > 8 and weight_bytes + 2 * tile * row_bytes > budget_bytes:
        tile //= 2
    return max(8, tile)


@functools.partial(jax.jit, static_argnames=("tile_b",))
def vae_forward(x, eps, params, *, tile_b=256):
    """VAE forward pass inside a single Pallas kernel, tiled over the batch.

    x:   (B, input_size) float32
    eps: (B, latent_size) float32  (randn_like(sigma) sampled outside)
    params: dict of weights (in, out) and biases (1, out)
    Returns (reconstruction, mu, sigma).
    """
    B, input_size = x.shape
    hidden_size = params["w_enc"].shape[1]
    latent_size = params["w_mu"].shape[1]
    output_size = params["w_d2"].shape[1]

    # --- Host-side prep: fuse mu|sigma heads and pad output feature dims to 128 lanes ---
    musig_pad = _round_up(2 * latent_size, 128)
    out_pad = _round_up(output_size, 128)

    w_musig = jnp.concatenate([params["w_mu"], params["w_sig"]], axis=1)
    b_musig = jnp.concatenate([params["b_mu"], params["b_sig"]], axis=1)
    w_musig = jnp.pad(w_musig, ((0, 0), (0, musig_pad - 2 * latent_size)))
    b_musig = jnp.pad(b_musig, ((0, 0), (0, musig_pad - 2 * latent_size)))
    w_d2 = jnp.pad(params["w_d2"], ((0, 0), (0, out_pad - output_size)))
    b_d2 = jnp.pad(params["b_d2"], ((0, 0), (0, out_pad - output_size)))

    weights = (params["w_enc"], params["b_enc"], w_musig, b_musig,
               params["w_d1"], params["b_d1"], w_d2, b_d2)
    weight_bytes = 4 * sum(int(a.size) for a in weights)

    # --- Batch tiling: pick the largest tile that keeps resident weights + double-buffered
    #     activation tiles (inputs, intermediates, outputs) inside scoped VMEM. ---
    row_bytes = 4 * (input_size + latent_size + 2 * hidden_size + musig_pad + out_pad)
    tile_b = _pick_tile_b(tile_b, B, row_bytes, weight_bytes)
    B_pad = _round_up(B, tile_b)
    if B_pad != B:
        x = jnp.pad(x, ((0, B_pad - B), (0, 0)))
        eps = jnp.pad(eps, ((0, B_pad - B), (0, 0)))
    grid = (B_pad // tile_b,)

    # Activations: tiled along batch. Weights/biases: same block every step -> stay resident.
    def w_spec(arr):
        return pl.BlockSpec(arr.shape, lambda i: (0, 0))

    in_specs = [
        pl.BlockSpec((tile_b, input_size), lambda i: (i, 0)),    # x
        pl.BlockSpec((tile_b, latent_size), lambda i: (i, 0)),   # eps
        w_spec(params["w_enc"]), w_spec(params["b_enc"]),
        w_spec(w_musig), w_spec(b_musig),
        w_spec(params["w_d1"]), w_spec(params["b_d1"]),
        w_spec(w_d2), w_spec(b_d2),
    ]
    out_specs = (
        pl.BlockSpec((tile_b, out_pad), lambda i: (i, 0)),       # recon (lane-dense)
        pl.BlockSpec((tile_b, musig_pad), lambda i: (i, 0)),     # mu|sigma (lane-dense)
    )
    out_shape = (
        jax.ShapeDtypeStruct((B_pad, out_pad), jnp.float32),
        jax.ShapeDtypeStruct((B_pad, musig_pad), jnp.float32),
    )

    flops = 2 * B_pad * (input_size * hidden_size
                         + hidden_size * musig_pad
                         + latent_size * hidden_size
                         + hidden_size * out_pad)
    transcendentals = B_pad * out_pad  # sigmoid
    bytes_accessed = (4 * (int(x.size) + int(eps.size))
                      + weight_bytes
                      + 4 * (B_pad * out_pad + B_pad * musig_pad))
    cost = pl.CostEstimate(flops=flops,
                           transcendentals=transcendentals,
                           bytes_accessed=bytes_accessed)

    recon_p, musig_p = pl.pallas_call(
        functools.partial(_vae_kernel, latent_size=latent_size),
        out_shape=out_shape,
        grid=grid,
        in_specs=in_specs,
        out_specs=out_specs,
        compiler_params=pltpu.CompilerParams(
            dimension_semantics=("parallel",)),
        cost_estimate=cost,
    )(x, eps,
      params["w_enc"], params["b_enc"],
      w_musig, b_musig,
      params["w_d1"], params["b_d1"],
      w_d2, b_d2)

    recon = recon_p[:B, :output_size]
    mu = musig_p[:B, :latent_size]
    sigma = musig_p[:B, latent_size:2 * latent_size]
    return recon, mu, sigma


def init_params(key, input_size, output_size, latent_size, hidden_size):
    """Deterministic init mimicking nn.Linear: U(-1/sqrt(fan_in), 1/sqrt(fan_in))."""
    def linear(k, fan_in, fan_out):
        kw, kb = jax.random.split(k)
        bound = 1.0 / jnp.sqrt(fan_in)
        w = jax.random.uniform(kw, (fan_in, fan_out), jnp.float32, -bound, bound)
        b = jax.random.uniform(kb, (1, fan_out), jnp.float32, -bound, bound)
        return w, b

    k1, k2, k3, k4, k5 = jax.random.split(key, 5)
    w_enc, b_enc = linear(k1, input_size, hidden_size)
    w_mu, b_mu = linear(k2, hidden_size, latent_size)
    w_sig, b_sig = linear(k3, hidden_size, latent_size)
    w_d1, b_d1 = linear(k4, latent_size, hidden_size)
    w_d2, b_d2 = linear(k5, hidden_size, output_size)
    return dict(w_enc=w_enc, b_enc=b_enc,
                w_mu=w_mu, b_mu=b_mu,
                w_sig=w_sig, b_sig=b_sig,
                w_d1=w_d1, b_d1=b_d1,
                w_d2=w_d2, b_d2=b_d2)


def vae_reference(x, eps, p):
    """Pure-JAX reference of the same forward pass for verification."""
    h = jnp.maximum(x @ p["w_enc"] + p["b_enc"], 0.0)
    mu = h @ p["w_mu"] + p["b_mu"]
    sigma = h @ p["w_sig"] + p["b_sig"]
    z = mu + eps * sigma
    hd = jnp.maximum(z @ p["w_d1"] + p["b_d1"], 0.0)
    recon = jax.nn.sigmoid(hd @ p["w_d2"] + p["b_d2"])
    return recon, mu, sigma


if __name__ == "__main__":
    # Small shapes consistent with the module's MLP structure.
    B = 8
    input_size = 16
    hidden_size = 32
    latent_size = 8
    output_size = 16

    key = jax.random.PRNGKey(0)
    k_params, k_x, k_eps = jax.random.split(key, 3)

    params = init_params(k_params, input_size, output_size, latent_size, hidden_size)
    x = jax.random.normal(k_x, (B, input_size), jnp.float32)
    # eps = torch.randn_like(sigma) in the original; sampled deterministically here
    # and passed into the kernel (RNG is glue, the dense math is in the kernel).
    eps = jax.random.normal(k_eps, (B, latent_size), jnp.float32)

    recon, mu, sigma = vae_forward(x, eps, params)
    jax.block_until_ready((recon, mu, sigma))

    recon_ref, mu_ref, sigma_ref = vae_reference(x, eps, params)
    assert recon.shape == (B, output_size) and mu.shape == (B, latent_size)
    assert sigma.shape == (B, latent_size)
    assert jnp.allclose(recon, recon_ref, atol=1e-5), "recon mismatch"
    assert jnp.allclose(mu, mu_ref, atol=1e-5), "mu mismatch"
    assert jnp.allclose(sigma, sigma_ref, atol=1e-5), "sigma mismatch"

    print("KERNEL_OK")
</pallas_src>

<mosaic_0001>
module attributes {stable_mosaic.version = 11 : i64} {
  func.func @_vae_kernel(%arg0: i32, %arg1: memref<8x16xf32, #tpu.memory_space<vmem>>, %arg2: memref<8x8xf32, #tpu.memory_space<vmem>>, %arg3: memref<16x32xf32, #tpu.memory_space<vmem>>, %arg4: memref<1x32xf32, #tpu.memory_space<vmem>>, %arg5: memref<32x128xf32, #tpu.memory_space<vmem>>, %arg6: memref<1x128xf32, #tpu.memory_space<vmem>>, %arg7: memref<8x32xf32, #tpu.memory_space<vmem>>, %arg8: memref<1x32xf32, #tpu.memory_space<vmem>>, %arg9: memref<32x128xf32, #tpu.memory_space<vmem>>, %arg10: memref<1x128xf32, #tpu.memory_space<vmem>>, %arg11: memref<8x128xf32, #tpu.memory_space<vmem>>, %arg12: memref<8x128xf32, #tpu.memory_space<vmem>>) attributes {dimension_semantics = [#tpu.dimension_semantics<parallel>], iteration_bounds = array<i64: 1>, scalar_prefetch = 0 : i64, scratch_operands = 0 : i64, tpu.core_type = #tpu.core_type<tc>, window_params = [{transform_indices = @transform_0, window_bounds = array<i64: 8, 16>}, {transform_indices = @transform_1, window_bounds = array<i64: 8, 8>}, {pipeline_mode = #tpu.pipeline_mode<synchronous>, transform_indices = @transform_2, window_bounds = array<i64: 16, 32>}, {pipeline_mode = #tpu.pipeline_mode<synchronous>, transform_indices = @transform_3, window_bounds = array<i64: 1, 32>}, {pipeline_mode = #tpu.pipeline_mode<synchronous>, transform_indices = @transform_4, window_bounds = array<i64: 32, 128>}, {pipeline_mode = #tpu.pipeline_mode<synchronous>, transform_indices = @transform_5, window_bounds = array<i64: 1, 128>}, {pipeline_mode = #tpu.pipeline_mode<synchronous>, transform_indices = @transform_6, window_bounds = array<i64: 8, 32>}, {pipeline_mode = #tpu.pipeline_mode<synchronous>, transform_indices = @transform_7, window_bounds = array<i64: 1, 32>}, {pipeline_mode = #tpu.pipeline_mode<synchronous>, transform_indices = @transform_8, window_bounds = array<i64: 32, 128>}, {pipeline_mode = #tpu.pipeline_mode<synchronous>, transform_indices = @transform_9, window_bounds = array<i64: 1, 128>}, {transform_indices = @transform_10, window_bounds = array<i64: 8, 128>}, {transform_indices = @transform_11, window_bounds = array<i64: 8, 128>}]} {
    %c0 = arith.constant 0 : index
    %c0_0 = arith.constant 0 : index
    %0 = vector.load %arg1[%c0, %c0_0] : memref<8x16xf32, #tpu.memory_space<vmem>>, vector<8x16xf32>
    %c0_1 = arith.constant 0 : index
    %c0_2 = arith.constant 0 : index
    %1 = vector.load %arg3[%c0_1, %c0_2] : memref<16x32xf32, #tpu.memory_space<vmem>>, vector<16x32xf32>
    %cst = arith.constant dense<0.000000e+00> : vector<8x32xf32>
    %2 = tpu.matmul %0, %1, %cst {dimension_numbers = #tpu.dot_dimension_numbers<[1], [0], [0], [1], [0, 0, 1, 1], [], []>} : vector<8x16xf32>, vector<16x32xf32>, vector<8x32xf32> -> vector<8x32xf32>
    %c0_3 = arith.constant 0 : index
    %c0_4 = arith.constant 0 : index
    %3 = vector.load %arg4[%c0_3, %c0_4] : memref<1x32xf32, #tpu.memory_space<vmem>>, vector<1x32xf32>
    %4 = vector.broadcast %3 : vector<1x32xf32> to vector<8x32xf32>
    %5 = arith.addf %2, %4 : vector<8x32xf32>
    %cst_5 = arith.constant 0.000000e+00 : f32
    %6 = vector.broadcast %cst_5 : f32 to vector<8x32xf32>
    %7 = arith.maximumf %5, %6 : vector<8x32xf32>
    %c0_6 = arith.constant 0 : index
    %c0_7 = arith.constant 0 : index
    %8 = vector.load %arg5[%c0_6, %c0_7] : memref<32x128xf32, #tpu.memory_space<vmem>>, vector<32x128xf32>
    %cst_8 = arith.constant dense<0.000000e+00> : vector<8x128xf32>
    %9 = tpu.matmul %7, %8, %cst_8 {dimension_numbers = #tpu.dot_dimension_numbers<[1], [0], [0], [1], [0, 0, 1, 1], [], []>} : vector<8x32xf32>, vector<32x128xf32>, vector<8x128xf32> -> vector<8x128xf32>
    %c0_9 = arith.constant 0 : index
    %c0_10 = arith.constant 0 : index
    %10 = vector.load %arg6[%c0_9, %c0_10] : memref<1x128xf32, #tpu.memory_space<vmem>>, vector<1x128xf32>
    %11 = vector.broadcast %10 : vector<1x128xf32> to vector<8x128xf32>
    %12 = arith.addf %9, %11 : vector<8x128xf32>
    %13 = vector.extract_strided_slice %12 {offsets = [0, 0], sizes = [8, 8], strides = [1, 1]} : vector<8x128xf32> to vector<8x8xf32>
    %14 = vector.extract_strided_slice %12 {offsets = [0, 8], sizes = [8, 8], strides = [1, 1]} : vector<8x128xf32> to vector<8x8xf32>
    %c0_11 = arith.constant 0 : index
    %c0_12 = arith.constant 0 : index
    %15 = vector.load %arg2[%c0_11, %c0_12] : memref<8x8xf32, #tpu.memory_space<vmem>>, vector<8x8xf32>
    %16 = arith.mulf %15, %14 : vector<8x8xf32>
    %17 = arith.addf %13, %16 : vector<8x8xf32>
    %c0_13 = arith.constant 0 : index
    %c0_14 = arith.constant 0 : index
    %18 = vector.load %arg7[%c0_13, %c0_14] : memref<8x32xf32, #tpu.memory_space<vmem>>, vector<8x32xf32>
    %cst_15 = arith.constant dense<0.000000e+00> : vector<8x32xf32>
    %19 = tpu.matmul %17, %18, %cst_15 {dimension_numbers = #tpu.dot_dimension_numbers<[1], [0], [0], [1], [0, 0, 1, 1], [], []>} : vector<8x8xf32>, vector<8x32xf32>, vector<8x32xf32> -> vector<8x32xf32>
    %c0_16 = arith.constant 0 : index
    %c0_17 = arith.constant 0 : index
    %20 = vector.load %arg8[%c0_16, %c0_17] : memref<1x32xf32, #tpu.memory_space<vmem>>, vector<1x32xf32>
    %21 = vector.broadcast %20 : vector<1x32xf32> to vector<8x32xf32>
    %22 = arith.addf %19, %21 : vector<8x32xf32>
    %cst_18 = arith.constant 0.000000e+00 : f32
    %23 = vector.broadcast %cst_18 : f32 to vector<8x32xf32>
    %24 = arith.maximumf %22, %23 : vector<8x32xf32>
    %c0_19 = arith.constant 0 : index
    %c0_20 = arith.constant 0 : index
    %25 = vector.load %arg9[%c0_19, %c0_20] : memref<32x128xf32, #tpu.memory_space<vmem>>, vector<32x128xf32>
    %cst_21 = arith.constant dense<0.000000e+00> : vector<8x128xf32>
    %26 = tpu.matmul %24, %25, %cst_21 {dimension_numbers = #tpu.dot_dimension_numbers<[1], [0], [0], [1], [0, 0, 1, 1], [], []>} : vector<8x32xf32>, vector<32x128xf32>, vector<8x128xf32> -> vector<8x128xf32>
    %c0_22 = arith.constant 0 : index
    %c0_23 = arith.constant 0 : index
    %27 = vector.load %arg10[%c0_22, %c0_23] : memref<1x128xf32, #tpu.memory_space<vmem>>, vector<1x128xf32>
    %28 = vector.broadcast %27 : vector<1x128xf32> to vector<8x128xf32>
    %29 = arith.addf %26, %28 : vector<8x128xf32>
    %30 = arith.negf %29 : vector<8x128xf32>
    %31 = math.exp %30 : vector<8x128xf32>
    %cst_24 = arith.constant 1.000000e+00 : f32
    %32 = vector.broadcast %cst_24 : f32 to vector<8x128xf32>
    %33 = arith.addf %32, %31 : vector<8x128xf32>
    %34 = arith.divf %32, %33 : vector<8x128xf32>
    %c0_25 = arith.constant 0 : index
    %c0_26 = arith.constant 0 : index
    %35 = vector.load %arg11[%c0_25, %c0_26] : memref<8x128xf32, #tpu.memory_space<vmem>>, vector<8x128xf32>
    tpu.vector_store %arg11[%c0_25, %c0_26], %34 {strides = array<i32>} : memref<8x128xf32, #tpu.memory_space<vmem>>, vector<8x128xf32>,
    %c0_27 = arith.constant 0 : index
    %c0_28 = arith.constant 0 : index
    %36 = vector.load %arg12[%c0_27, %c0_28] : memref<8x128xf32, #tpu.memory_space<vmem>>, vector<8x128xf32>
    tpu.vector_store %arg12[%c0_27, %c0_28], %12 {strides = array<i32>} : memref<8x128xf32, #tpu.memory_space<vmem>>, vector<8x128xf32>,
    return
  }
  func.func @transform_0(%arg0: i32) -> (i32, i32) {
    %c0_i32 = arith.constant 0 : i32
    %c0_i32_0 = arith.constant 0 : i32
    return %arg0, %c0_i32 : i32, i32
  }
  func.func @transform_1(%arg0: i32) -> (i32, i32) {
    %c0_i32 = arith.constant 0 : i32
    %c0_i32_0 = arith.constant 0 : i32
    return %arg0, %c0_i32 : i32, i32
  }
  func.func @transform_2(%arg0: i32) -> (i32, i32) {
    %c0_i32 = arith.constant 0 : i32
    %c0_i32_0 = arith.constant 0 : i32
    %c0_i32_1 = arith.constant 0 : i32
    return %c0_i32, %c0_i32_0 : i32, i32
  }
  func.func @transform_3(%arg0: i32) -> (i32, i32) {
    %c0_i32 = arith.constant 0 : i32
    %c0_i32_0 = arith.constant 0 : i32
    %c0_i32_1 = arith.constant 0 : i32
    return %c0_i32, %c0_i32_0 : i32, i32
  }
  func.func @transform_4(%arg0: i32) -> (i32, i32) {
    %c0_i32 = arith.constant 0 : i32
    %c0_i32_0 = arith.constant 0 : i32
    %c0_i32_1 = arith.constant 0 : i32
    return %c0_i32, %c0_i32_0 : i32, i32
  }
  func.func @transform_5(%arg0: i32) -> (i32, i32) {
    %c0_i32 = arith.constant 0 : i32
    %c0_i32_0 = arith.constant 0 : i32
    %c0_i32_1 = arith.constant 0 : i32
    return %c0_i32, %c0_i32_0 : i32, i32
  }
  func.func @transform_6(%arg0: i32) -> (i32, i32) {
    %c0_i32 = arith.constant 0 : i32
    %c0_i32_0 = arith.constant 0 : i32
    %c0_i32_1 = arith.constant 0 : i32
    return %c0_i32, %c0_i32_0 : i32, i32
  }
  func.func @transform_7(%arg0: i32) -> (i32, i32) {
    %c0_i32 = arith.constant 0 : i32
    %c0_i32_0 = arith.constant 0 : i32
    %c0_i32_1 = arith.constant 0 : i32
    return %c0_i32, %c0_i32_0 : i32, i32
  }
  func.func @transform_8(%arg0: i32) -> (i32, i32) {
    %c0_i32 = arith.constant 0 : i32
    %c0_i32_0 = arith.constant 0 : i32
    %c0_i32_1 = arith.constant 0 : i32
    return %c0_i32, %c0_i32_0 : i32, i32
  }
  func.func @transform_9(%arg0: i32) -> (i32, i32) {
    %c0_i32 = arith.constant 0 : i32
    %c0_i32_0 = arith.constant 0 : i32
    %c0_i32_1 = arith.constant 0 : i32
    return %c0_i32, %c0_i32_0 : i32, i32
  }
  func.func @transform_10(%arg0: i32) -> (i32, i32) {
    %c0_i32 = arith.constant 0 : i32
    %c0_i32_0 = arith.constant 0 : i32
    return %arg0, %c0_i32 : i32, i32
  }
  func.func @transform_11(%arg0: i32) -> (i32, i32) {
    %c0_i32 = arith.constant 0 : i32
    %c0_i32_0 = arith.constant 0 : i32
    return %arg0, %c0_i32 : i32, i32
  }
}

</mosaic_0001>

<bundles_post_ra>
// kernel: vae_forward.1
= control target key start
LH: loop header
LB: loop body
LE: loop exit
PB: predicated region body
PF: predicated region fallthrough
CT: control target
= control target key end

     0   :  { %vm45_vm0 = vcmask 130048   ;;  %s373_s0 = inlined_call_operand.vmem [shape: f32[8,16], index: 0, kind: input, shape index: {}]   ;;  %s374_s1 = inlined_call_operand.vmem [shape: f32[8,8], index: 1, kind: input, shape index: {}]   ;;  %s375_s2 = inlined_call_operand.vmem [shape: f32[16,32], index: 2, kind: input, shape index: {}]   ;;  %s376_s3 = inlined_call_operand.vmem [shape: f32[1,32], index: 3, kind: input, shape index: {}]   ;;  %s377_s4 = inlined_call_operand.vmem [shape: f32[32,128], index: 4, kind: input, shape index: {}]   ;;  %s378_s5 = inlined_call_operand.vmem [shape: f32[1,128], index: 5, kind: input, shape index: {}]   ;;  %s379_s6 = inlined_call_operand.vmem [shape: f32[8,32], index: 6, kind: input, shape index: {}]   ;;  %s380_s7 = inlined_call_operand.vmem [shape: f32[1,32], index: 7, kind: input, shape index: {}]   ;;  %s381_s8 = inlined_call_operand.vmem [shape: f32[32,128], index: 8, kind: input, shape index: {}]   ;;  %s382_s9 = inlined_call_operand.vmem [shape: f32[1,128], index: 9, kind: input, shape index: {}]   ;;  %s383_s10 = inlined_call_operand.hbm [shape: f32[8,128], index: 10, kind: output, shape index: {0}]   ;;  %s384_s11 = inlined_call_operand.vmem [shape: f32[8,128], index: 11, kind: output, shape index: {1}]  }
   0x1   :  { %v40_v0 = vld [vmem:[%s375_s2 + $0x8] sm:$0xff]  ;;  %v39_v1 = vld [vmem:[%s375_s2] sm:$0xff]  ;;  %v73_v3 = vld [vmem:[%s377_s4 + $0x18] sm:$0xff] }
   0x2   :  { %63 = vmatpush.msra.mxu0 %v40_v0  ;;  %v38_v2 = vld [vmem:[%s373_s0] sm:$0xff]  ;;  %94 = vmatpush.msra.mxu1 %v73_v3 }
   0x4   :  { %64 = vmatpush.msra.mxu0 %v39_v1 }
   0x5   :  { %17 = vsyncpa [#allocation3], 0  ;;  %211 = vmatmul.msk.f32.vlgmr.msra.gmra.mxu0 %vm45_vm0, %v38_v2  ;;  %v72_v4 = vld [vmem:[%s377_s4 + $0x10] sm:$0xff]  ;;  %v71_v5 = vld [vmem:[%s377_s4 + $0x8] sm:$0xff]  ;;  %vm78_vm1 = vcmask 261120   ;;  %vm114_vm2 = vcmask 64512  }
   0x6   :  { %95 = vmatpush.msra.mxu1 %v72_v4  ;;  %v70_v6 = vld [vmem:[%s377_s4] sm:$0xff]  ;;  %s252_s4 = smov 120   ;;  %v142_v15 = vld [vmem:[%s381_s8 + $0x18] sm:$0xff]  ;;  %v141_v20 = vld [vmem:[%s381_s8 + $0x10] sm:$0xff] }
   0x7   :  { %v218_v7 = vld [vmem:[%s376_s3] ss:$0 sm:$0xff]  ;;  %162 = vmatpush.msra.mxu3 %v142_v15  ;;  %v140_v21 = vld [vmem:[%s381_s8 + $0x8] sm:$0xff] }
   0x8   :  { %96 = vmatpush.msra.mxu1 %v71_v5  ;;  %v219_v11 = vld [vmem:[%s378_s5] ss:$0 sm:$0xff] }
   0x9   :  { %v109_v14 = vld [vmem:[%s379_s6] sm:$0xff]  ;;  %163 = vmatpush.msra.mxu3 %v141_v20 }
   0xa   :  { %97 = vmatpush.msra.mxu1 %v70_v6  ;;  %133 = vmatpush.msra.mxu2 %v109_v14  ;;  %v102_v16 = vld [vmem:[%s374_s1] sm:$0xff] }
   0xb   :  { %164 = vmatpush.msra.mxu3 %v140_v21  ;;  %v139_v22 = vld [vmem:[%s381_s8] sm:$0xff] }
   0xc   :  { %v220_v23 = vld [vmem:[%s380_s7] ss:$0 sm:$0xff]  ;;  %s253_s7 = smov [#allocation2]  }
   0xd   :  { %165 = vmatpush.msra.mxu3 %v139_v22  ;;  %v221_v27 = vld [vmem:[%s382_s9] ss:$0 sm:$0xff]  ;;  %s196_s8 = sshll.u32 %s253_s7, 4  ;;  %s198_s9 = sshll.u32 %s383_s10, 4  ;;  %s197_s8 = int_to_ptr.vmem [resolvable:$true] %s196_s8  ;;  %s199_s9 = int_to_ptr.hbm [resolvable:$true] %s198_s9 }
  0x82   :  { %v66_v8 = vpop.f32.mrf.mxu0 }
  0x83   :  { %v67_v9 = vadd.f32 %v218_v7, %v66_v8 }
  0x85   :  { %v69_v10 = vmax.f32 %v67_v9, 0.0 }
  0x87   :  { %212 = vmatmul.msk.f32.vlgmr.msra.gmra.mxu1 %vm78_vm1, %v69_v10 }
 0x104   :  { %v99_v12 = vpop.f32.mrf.mxu1 }
 0x105   :  { %v100_v13 = vadd.f32 %v219_v11, %v99_v12 }
 0x107   :  { %190 = vst [vmem:[%s384_s11] sm:$0xff] %v100_v13  ;;  %104 = vrot.lane.b32.xlu0 %v100_v13, %s252_s4 }
 0x179   :  { %v105_v17 = vpop.permute.xlu0 %104 }
 0x17a   :  { %v107_v18 = vmul.f32 %v105_v17, %v102_v16 }
 0x17c   :  { %v108_v19 = vadd.f32 %v107_v18, %v100_v13 }
 0x17e   :  { %213 = vmatmul.msk.f32.vlgmr.msra.gmra.mxu2 %vm114_vm2, %v108_v19 }
 0x201   :  { %v135_v24 = vpop.f32.mrf.mxu2 }
 0x202   :  { %v136_v25 = vadd.f32 %v220_v23, %v135_v24 }
 0x204   :  { %v138_v26 = vmax.f32 %v136_v25, 0.0 }
 0x206   :  { %214 = vmatmul.msk.f32.vlgmr.msra.gmra.mxu3 %vm78_vm1, %v138_v26 }
 0x289   :  { %v167_v28 = vpop.f32.mrf.mxu3 }
 0x28a   :  { %v168_v29 = vadd.f32 %v221_v27, %v167_v28 }
 0x28c   :  { %v215_v30 = vmul.f32 -1.442695, %v168_v29 }
 0x28e   :  { %222 = vpow2.f32 %v215_v30 }
 0x294   :  { %v223_v31 = vpop.eup %222 }
 0x295   :  { %v173_v32 = vadd.f32 1.0, %v223_v31 }
 0x297   :  { %224 = vrcp.f32 %v173_v32  ;;  %v185_v36 = vand.u32 2147483648, %v173_v32  ;;  %v183_v38 = vand.u32 2147483647, %v173_v32  ;;  %vm179_vm4 = vweird.f32 %v173_v32 }
 0x299   :  { %v186_v40 = vor.u32 1.1754944e-38, %v185_v36  ;;  %vm184_vm6 = vcmp.eq.f32.partialorder %v183_v38, 8.507059e+37 }
 0x29d   :  { %v225_v33 = vpop.eup %224 }
 0x29e   :  { %v175_v34 = vmul.f32 %v225_v33, %v173_v32  ;;  %vm180_vm3 = vweird.f32 %v225_v33 }
 0x29f   :  { %vm181_vm5 = vmor %vm179_vm4, %vm180_vm3 }
 0x2a0   :  { %v176_v35 = vsub.f32 1.0, %v175_v34 }
 0x2a2   :  { %v177_v37 = vmul.f32 %v225_v33, %v176_v35 }
 0x2a4   :  { %v178_v39 = vadd.f32 %v225_v33, %v177_v37 }
 0x2a6   :  { %v182_v41 = vsel %vm181_vm5, %v225_v33, %v178_v39 }
 0x2a7   :  { %v187_v42 = vsel %vm184_vm6, %v186_v40, %v182_v41 }
 0x2a8   :  { %189 = vst [vmem:[#allocation2] sm:$0xff] %v187_v42 }
 0x2a9   :  { %201 = dma.vmem_to_hbm [thread:$0]  %s197_s8, 128, %s199_s9, [#allocation3]  }
 0x2aa   :  { %250 = dma.done.wait [#allocation3], 128  }
 0x2ab   :  { %251 = vsyncadd [#allocation3], 4294967168 }
 0x2ac   :  { %210 = vsyncpa [#allocation3], 1 }

</bundles_post_ra>
